<compile_context>
chip_gen: v5e
topology: v5e:2x2
jax: 0.10.0
libtpu: 0.0.40
codegen_flags: <defaults>
</compile_context>

<pallas_src>
import math

import jax
import jax.numpy as jnp
from jax.experimental import pallas as pl
from jax.experimental.pallas import tpu as pltpu


# ---------------------------------------------------------------------------
# Stage 1: tiny MLP producing the positional-embedding slab (S, D), run once.
# ---------------------------------------------------------------------------
def _make_pos_mlp_kernel(s, denom, ts, hidden):
    half = float(s // 2)
    inv_denom = 1.0 / float(denom)
    inv_s = 1.0 / float(s)

    def kernel(w1_ref, b1_ref, w2_ref, pos_ref):
        # Row indices of this S-tile, generated in-kernel (no (S, 2) input).
        base = (pl.program_id(0) * ts).astype(jnp.float32)
        row = base + jax.lax.broadcasted_iota(
            jnp.int32, (ts, hidden), 0).astype(jnp.float32)
        ih = jnp.floor(row * inv_s)          # row // s  (exact for realistic S)
        iw = row - ih * s                    # row %  s
        ch = (ih - half) * inv_denom         # torch: (i - s//2) / (s//2)
        cw = (iw - half) * inv_denom
        # K=2 "matmul" as two VPU broadcast-FMAs (MXU would be <2% utilized).
        h = ch * w1_ref[0:1, :] + cw * w1_ref[1:2, :] + b1_ref[...]
        h = jnp.maximum(h, 0.0)              # ReLU
        # 512 -> D on the MXU, f32 accumulate, single cast to output dtype.
        pos_ref[...] = jnp.dot(
            h, w2_ref[...], preferred_element_type=jnp.float32
        ).astype(pos_ref.dtype)

    return kernel


# ---------------------------------------------------------------------------
# Stage 2: broadcast-add of the resident pos row onto lane-dense x blocks.
# ---------------------------------------------------------------------------
def _broadcast_add_kernel(pos_ref, x_ref, o_ref):
    # pos_ref: (1, bl) tile in x.dtype, grid-invariant along the batch axis.
    # x_ref / o_ref: (bb, bl) tiles of the flattened (B, S*D) view.
    o_ref[...] = x_ref[...] + pos_ref[...]


def _pick_stage2_tiles(batch, length, itemsize, target_bytes=4 << 20,
                       lane_cap=32768):
    """2-D tiling for the flattened (B, L=S*D) add.

    Lane tile bl: full L when it fits, else a 128-multiple cap (lane-dense,
    unmasked stores, VMEM bounded independent of L).
    Batch tile bb: ~target_bytes per block, multiple of 8 (or == batch).
    ~4 MiB blocks amortize the ~0.35us per-grid-step overhead on v6e/v7x while
    double-buffered in+out (~16-20 MiB) fits every generation's VMEM.
    """
    if length <= lane_cap:
        bl = length                       # == full array dim -> always legal
    else:
        bl = lane_cap                     # multiple of 128

    bb = max(1, target_bytes // (bl * itemsize))
    if bb >= batch:
        bb = batch                        # == full array dim -> always legal
    elif bb >= 8:
        bb = (bb // 8) * 8                # dense sublanes
    else:
        bb = 8 if batch >= 8 else batch   # tiny batch: full-dim block
    return int(bb), int(bl)


def pos_emb_mlp_swin_v1d(x, w1, b1, w2):
    """Forward of PosEmbMLPSwinv1D (rank=2, conv=False, deploy=False).

    Args:
      x:  (B, S, D) input, S must be a perfect square.
      w1: (2, 512)  first Linear weight (input-major, i.e. torch weight.T).
      b1: (512,)    first Linear bias.
      w2: (512, D)  second Linear weight (input-major), no bias.
    Returns:
      (B, S, D) = x + pos_emb (pos_emb broadcast over batch), dtype of x.
    """
    B, S, D = x.shape
    H = w1.shape[1]

    # --- relative coordinate grid parameters (float32 math, torch 'ij' order)
    s = math.isqrt(S)
    assert s * s == S, "seq_length must be a perfect square for rank=2"
    denom = max(s // 2, 1)  # guard s==1 (PyTorch divides by zero -> NaN there)

    w1f = w1.astype(jnp.float32)
    b1f = b1.astype(jnp.float32).reshape(1, H)
    w2f = w2.astype(jnp.float32)

    # --- Stage 1: compute pos once (batch-invariant; hoisted out of the loop)
    ts = S if S <= 1024 else 1024          # S-row tile (multiple of 8 or == S)
    pos = pl.pallas_call(
        _make_pos_mlp_kernel(s, denom, ts, H),
        out_shape=jax.ShapeDtypeStruct((S, D), x.dtype),
        grid_spec=pltpu.PrefetchScalarGridSpec(
            num_scalar_prefetch=0,
            grid=(pl.cdiv(S, ts),),
            in_specs=[
                pl.BlockSpec((2, H), lambda i: (0, 0)),   # W1 (resident)
                pl.BlockSpec((1, H), lambda i: (0, 0)),   # b1 (resident)
                pl.BlockSpec((H, D), lambda i: (0, 0)),   # W2 (resident)
            ],
            out_specs=pl.BlockSpec((ts, D), lambda i: (i, 0)),
        ),
        compiler_params=pltpu.CompilerParams(
            dimension_semantics=("arbitrary",)),
    )(w1f, b1f, w2f)

    # --- Stage 2: lane-dense broadcast add over a 2-D (batch, lane) grid ---
    L = S * D
    itemsize = x.dtype.itemsize
    x2d = x.reshape(B, L)                  # row-major reshape: metadata only
    pos_row = pos.reshape(1, L)            # already x.dtype

    bb, bl = _pick_stage2_tiles(B, L, itemsize)
    grid = (pl.cdiv(B, bb), pl.cdiv(L, bl))

    # VMEM budget: 2 pipeline bufs x (in + out) blocks + 2 x pos tile + slack.
    block_bytes = bb * bl * itemsize
    vmem_budget = 4 * block_bytes + 2 * bl * itemsize + (4 << 20)
    vmem_limit = int(min(max(vmem_budget, 32 << 20), 48 << 20))

    out2d = pl.pallas_call(
        _broadcast_add_kernel,
        out_shape=jax.ShapeDtypeStruct((B, L), x.dtype),
        grid_spec=pltpu.PrefetchScalarGridSpec(
            num_scalar_prefetch=0,
            grid=grid,
            in_specs=[
                pl.BlockSpec((1, bl), lambda i, j: (0, j)),    # pos row tile
                pl.BlockSpec((bb, bl), lambda i, j: (i, j)),   # x tile
            ],
            out_specs=pl.BlockSpec((bb, bl), lambda i, j: (i, j)),
        ),
        compiler_params=pltpu.CompilerParams(
            dimension_semantics=("parallel", "parallel"),
            vmem_limit_bytes=vmem_limit,
        ),
        cost_estimate=pl.CostEstimate(
            flops=int(B * L),
            transcendentals=0,
            bytes_accessed=int(2 * B * L * itemsize + L * itemsize),
        ),
    )(pos_row, x2d)

    return out2d.reshape(B, S, D)


# ---------------------------------------------------------------------------
# Pure-JAX reference (high-precision) for sanity checking.
# ---------------------------------------------------------------------------
def _reference(x, w1, b1, w2):
    B, S, D = x.shape
    s = math.isqrt(S)
    denom = max(s // 2, 1)
    idx = jnp.arange(s, dtype=jnp.float32)
    c = (idx - (s // 2)) / denom
    ch, cw = jnp.meshgrid(c, c, indexing="ij")
    coords = jnp.stack([ch.reshape(-1), cw.reshape(-1)], axis=-1)   # (S, 2)
    h = jnp.maximum(
        jnp.dot(coords, w1.astype(jnp.float32), precision="highest")
        + b1.astype(jnp.float32), 0.0)
    pos = jnp.dot(h, w2.astype(jnp.float32), precision="highest")
    return (x.astype(jnp.float32) + pos[None, :, :]).astype(x.dtype)


if __name__ == "__main__":
    # Small shapes consistent with the module: dim=64, seq_length=16 (4x4
    # grid), batch=2, hidden=512 (fixed by nn.Linear(2, 512)).
    B, S, D, H = 2, 16, 64, 512

    key = jax.random.PRNGKey(0)
    kx, kw1, kb1, kw2 = jax.random.split(key, 4)

    x = jax.random.normal(kx, (B, S, D), dtype=jnp.float32)
    w1 = jax.random.normal(kw1, (2, H), dtype=jnp.float32) * 0.1
    b1 = jax.random.normal(kb1, (H,), dtype=jnp.float32) * 0.1
    w2 = jax.random.normal(kw2, (H, D), dtype=jnp.float32) * 0.05

    fwd = jax.jit(pos_emb_mlp_swin_v1d)
    out = jax.block_until_ready(fwd(x, w1, b1, w2))

    ref = _reference(x, w1, b1, w2)
    assert out.shape == (B, S, D)
    assert jnp.allclose(out, ref, atol=1e-3, rtol=1e-3), "mismatch vs reference"

    print("KERNEL_OK")
</pallas_src>

<mosaic_0001>
module attributes {stable_mosaic.version = 11 : i64} {
  func.func @kernel(%arg0: i32, %arg1: memref<2x512xf32, #tpu.memory_space<vmem>>, %arg2: memref<1x512xf32, #tpu.memory_space<vmem>>, %arg3: memref<512x64xf32, #tpu.memory_space<vmem>>, %arg4: memref<16x64xf32, #tpu.memory_space<vmem>>) attributes {dimension_semantics = [#tpu.dimension_semantics<arbitrary>], iteration_bounds = array<i64: 1>, scalar_prefetch = 0 : i64, scratch_operands = 0 : i64, tpu.core_type = #tpu.core_type<tc>, window_params = [{pipeline_mode = #tpu.pipeline_mode<synchronous>, transform_indices = @transform_0, window_bounds = array<i64: 2, 512>}, {pipeline_mode = #tpu.pipeline_mode<synchronous>, transform_indices = @transform_1, window_bounds = array<i64: 1, 512>}, {pipeline_mode = #tpu.pipeline_mode<synchronous>, transform_indices = @transform_2, window_bounds = array<i64: 512, 64>}, {transform_indices = @transform_3, window_bounds = array<i64: 16, 64>}]} {
    %c16_i32 = arith.constant 16 : i32
    %0 = arith.muli %arg0, %c16_i32 : i32
    %1 = arith.sitofp %0 : i32 to f32
    %2 = tpu.iota {dimensions = array<i32: 0>} : vector<16x512xi32>
    %3 = arith.sitofp %2 : vector<16x512xi32> to vector<16x512xf32>
    %4 = vector.broadcast %1 : f32 to vector<16x512xf32>
    %5 = arith.addf %4, %3 : vector<16x512xf32>
    %cst = arith.constant 2.500000e-01 : f32
    %6 = vector.broadcast %cst : f32 to vector<16x512xf32>
    %7 = arith.mulf %5, %6 : vector<16x512xf32>
    %8 = math.floor %7 : vector<16x512xf32>
    %cst_0 = arith.constant 4.000000e+00 : f32
    %9 = vector.broadcast %cst_0 : f32 to vector<16x512xf32>
    %10 = arith.mulf %8, %9 : vector<16x512xf32>
    %11 = arith.subf %5, %10 : vector<16x512xf32>
    %cst_1 = arith.constant 2.000000e+00 : f32
    %12 = vector.broadcast %cst_1 : f32 to vector<16x512xf32>
    %13 = arith.subf %8, %12 : vector<16x512xf32>
    %cst_2 = arith.constant 5.000000e-01 : f32
    %14 = vector.broadcast %cst_2 : f32 to vector<16x512xf32>
    %15 = arith.mulf %13, %14 : vector<16x512xf32>
    %cst_3 = arith.constant 2.000000e+00 : f32
    %16 = vector.broadcast %cst_3 : f32 to vector<16x512xf32>
    %17 = arith.subf %11, %16 : vector<16x512xf32>
    %cst_4 = arith.constant 5.000000e-01 : f32
    %18 = vector.broadcast %cst_4 : f32 to vector<16x512xf32>
    %19 = arith.mulf %17, %18 : vector<16x512xf32>
    %c0 = arith.constant 0 : index
    %c0_5 = arith.constant 0 : index
    %20 = vector.load %arg1[%c0, %c0_5] : memref<2x512xf32, #tpu.memory_space<vmem>>, vector<1x512xf32>
    %21 = vector.broadcast %20 : vector<1x512xf32> to vector<16x512xf32>
    %22 = arith.mulf %15, %21 : vector<16x512xf32>
    %c1 = arith.constant 1 : index
    %c0_6 = arith.constant 0 : index
    %23 = vector.load %arg1[%c1, %c0_6] : memref<2x512xf32, #tpu.memory_space<vmem>>, vector<1x512xf32>
    %24 = vector.broadcast %23 : vector<1x512xf32> to vector<16x512xf32>
    %25 = arith.mulf %19, %24 : vector<16x512xf32>
    %26 = arith.addf %22, %25 : vector<16x512xf32>
    %c0_7 = arith.constant 0 : index
    %c0_8 = arith.constant 0 : index
    %27 = vector.load %arg2[%c0_7, %c0_8] : memref<1x512xf32, #tpu.memory_space<vmem>>, vector<1x512xf32>
    %28 = vector.broadcast %27 : vector<1x512xf32> to vector<16x512xf32>
    %29 = arith.addf %26, %28 : vector<16x512xf32>
    %cst_9 = arith.constant 0.000000e+00 : f32
    %30 = vector.broadcast %cst_9 : f32 to vector<16x512xf32>
    %31 = arith.maximumf %29, %30 : vector<16x512xf32>
    %c0_10 = arith.constant 0 : index
    %c0_11 = arith.constant 0 : index
    %32 = vector.load %arg3[%c0_10, %c0_11] : memref<512x64xf32, #tpu.memory_space<vmem>>, vector<512x64xf32>
    %cst_12 = arith.constant dense<0.000000e+00> : vector<16x64xf32>
    %33 = tpu.matmul %31, %32, %cst_12 {dimension_numbers = #tpu.dot_dimension_numbers<[1], [0], [0], [1], [0, 0, 1, 1], [], []>} : vector<16x512xf32>, vector<512x64xf32>, vector<16x64xf32> -> vector<16x64xf32>
    %c0_13 = arith.constant 0 : index
    %c0_14 = arith.constant 0 : index
    %34 = vector.load %arg4[%c0_13, %c0_14] : memref<16x64xf32, #tpu.memory_space<vmem>>, vector<16x64xf32>
    tpu.vector_store %arg4[%c0_13, %c0_14], %33 {strides = array<i32>} : memref<16x64xf32, #tpu.memory_space<vmem>>, vector<16x64xf32>,
    return
  }
  func.func @transform_0(%arg0: i32) -> (i32, i32) {
    %c0_i32 = arith.constant 0 : i32
    %c0_i32_0 = arith.constant 0 : i32
    %c0_i32_1 = arith.constant 0 : i32
    return %c0_i32, %c0_i32_0 : i32, i32
  }
  func.func @transform_1(%arg0: i32) -> (i32, i32) {
    %c0_i32 = arith.constant 0 : i32
    %c0_i32_0 = arith.constant 0 : i32
    %c0_i32_1 = arith.constant 0 : i32
    return %c0_i32, %c0_i32_0 : i32, i32
  }
  func.func @transform_2(%arg0: i32) -> (i32, i32) {
    %c0_i32 = arith.constant 0 : i32
    %c0_i32_0 = arith.constant 0 : i32
    %c0_i32_1 = arith.constant 0 : i32
    return %c0_i32, %c0_i32_0 : i32, i32
  }
  func.func @transform_3(%arg0: i32) -> (i32, i32) {
    %c0_i32 = arith.constant 0 : i32
    %c0_i32_0 = arith.constant 0 : i32
    return %arg0, %c0_i32 : i32, i32
  }
}

module attributes {stable_mosaic.version = 11 : i64} {
  func.func @_broadcast_add_kernel(%arg0: i32, %arg1: i32, %arg2: memref<1x1024xf32, #tpu.memory_space<vmem>>, %arg3: memref<2x1024xf32, #tpu.memory_space<vmem>>, %arg4: memref<2x1024xf32, #tpu.memory_space<vmem>>) attributes {dimension_semantics = [#tpu.dimension_semantics<parallel>, #tpu.dimension_semantics<parallel>], iteration_bounds = array<i64: 1, 1>, scalar_prefetch = 0 : i64, scratch_operands = 0 : i64, tpu.core_type = #tpu.core_type<tc>, window_params = [{transform_indices = @transform_0, window_bounds = array<i64: 1, 1024>}, {transform_indices = @transform_1, window_bounds = array<i64: 2, 1024>}, {transform_indices = @transform_2, window_bounds = array<i64: 2, 1024>}]} {
    %c0 = arith.constant 0 : index
    %c0_0 = arith.constant 0 : index
    %0 = vector.load %arg3[%c0, %c0_0] : memref<2x1024xf32, #tpu.memory_space<vmem>>, vector<2x1024xf32>
    %c0_1 = arith.constant 0 : index
    %c0_2 = arith.constant 0 : index
    %1 = vector.load %arg2[%c0_1, %c0_2] : memref<1x1024xf32, #tpu.memory_space<vmem>>, vector<1x1024xf32>
    %2 = vector.broadcast %1 : vector<1x1024xf32> to vector<2x1024xf32>
    %3 = arith.addf %0, %2 : vector<2x1024xf32>
    %c0_3 = arith.constant 0 : index
    %c0_4 = arith.constant 0 : index
    %4 = vector.load %arg4[%c0_3, %c0_4] : memref<2x1024xf32, #tpu.memory_space<vmem>>, vector<2x1024xf32>
    tpu.vector_store %arg4[%c0_3, %c0_4], %3 {strides = array<i32>} : memref<2x1024xf32, #tpu.memory_space<vmem>>, vector<2x1024xf32>,
    return
  }
  func.func @transform_0(%arg0: i32, %arg1: i32) -> (i32, i32) {
    %c0_i32 = arith.constant 0 : i32
    %c0_i32_0 = arith.constant 0 : i32
    return %c0_i32, %arg1 : i32, i32
  }
  func.func @transform_1(%arg0: i32, %arg1: i32) -> (i32, i32) {
    %c0_i32 = arith.constant 0 : i32
    return %arg0, %arg1 : i32, i32
  }
  func.func @transform_2(%arg0: i32, %arg1: i32) -> (i32, i32) {
    %c0_i32 = arith.constant 0 : i32
    return %arg0, %arg1 : i32, i32
  }
}

</mosaic_0001>

<bundles_post_ra>
// kernel: pos_emb_mlp_swin_v1d.3
= control target key start
LH: loop header
LB: loop body
LE: loop exit
PB: predicated region body
PF: predicated region fallthrough
CT: control target
= control target key end

     0   :  { %vm29_vm0 = vcmask 1041408   ;;  %vm31_vm1 = vcmask 1045508   ;;  %vm33_vm2 = vcmask 1043456   ;;  %s82_s0 = inlined_call_operand.vmem [shape: f32[1,1024], index: 0, kind: input, shape index: {}]   ;;  %s83_s1 = inlined_call_operand.vmem [shape: f32[2,1024], index: 1, kind: input, shape index: {}]   ;;  %s84_s2 = inlined_call_operand.vmem [shape: f32[2,1024], index: 2, kind: output, shape index: {}]  }
   0x1   :  { %v13_v0 = vld [vmem:[%s82_s0] sm:$0xff]  ;;  %v12_v18 = vld [vmem:[%s83_s1 + $0x8] sm:$0xff] }
   0x2   :  { %v15_v1 = vperm.slane %v13_v0, 0  ;;  %v16_v2 = vperm.slane %v13_v0, 1  ;;  %v17_v3 = vperm.slane %v13_v0, 2  ;;  %v18_v4 = vperm.slane %v13_v0, 3  ;;  %v11_v12 = vld [vmem:[%s83_s1] sm:$0xff] }
   0x3   :  { %v19_v5 = vperm.slane %v13_v0, 4  ;;  %v20_v6 = vperm.slane %v13_v0, 5  ;;  %v21_v7 = vperm.slane %v13_v0, 6  ;;  %v22_v8 = vperm.slane %v13_v0, 7 }
   0x4   :  { %v23_v9 = vrot.slane %v16_v2, 6  ;;  %v24_v10 = vrot.slane %v17_v3, 4  ;;  %v25_v11 = vrot.slane %v18_v4, 2 }
   0x5   :  { %v26_v13 = vrot.slane %v20_v6, 6  ;;  %v27_v14 = vrot.slane %v21_v7, 4  ;;  %v28_v15 = vrot.slane %v22_v8, 2 }
   0x6   :  { %v30_v16 = vsel %vm29_vm0, %v15_v1, %v23_v9  ;;  %v32_v17 = vsel %vm31_vm1, %v24_v10, %v25_v11 }
   0x7   :  { %v34_v19 = vsel %vm33_vm2, %v30_v16, %v32_v17  ;;  %v35_v20 = vsel %vm29_vm0, %v19_v5, %v26_v13  ;;  %v36_v21 = vsel %vm31_vm1, %v27_v14, %v28_v15 }
   0x8   :  { %v40_v22 = vadd.f32 %v34_v19, %v11_v12  ;;  %v37_v23 = vsel %vm33_vm2, %v35_v20, %v36_v21 }
   0x9   :  { %v41_v24 = vadd.f32 %v37_v23, %v12_v18 }
   0xa   :  { %42 = vst [vmem:[%s84_s2] sm:$0xff] %v40_v22 }
   0xb   :  { %43 = vst [vmem:[%s84_s2 + $0x8] sm:$0xff] %v41_v24 }

// kernel: pos_emb_mlp_swin_v1d.2
= control target key start
LH: loop header
LB: loop body
LE: loop exit
PB: predicated region body
PF: predicated region fallthrough
CT: control target
= control target key end

     0   :  { %v16_v0 = vlaneseq  ;;  %vm267_vm0 = vcmask 523264   ;;  %s544_s2 = inlined_call_operand.vmem [shape: f32[512,64], index: 2, kind: input, shape index: {}]   ;;  %s545_s0 = inlined_call_operand.vmem [shape: f32[2,512], index: 0, kind: input, shape index: {}]   ;;  %s546_s1 = inlined_call_operand.vmem [shape: f32[1,512], index: 1, kind: input, shape index: {}]   ;;  %s547_s3 = inlined_call_operand.vmem [shape: f32[16,64], index: 3, kind: output, shape index: {}]  }
   0x1   :  { %v158_v1 = vld [vmem:[%s544_s2 + $0x178] sm:$0xff]  ;;  %v157_v2 = vld [vmem:[%s544_s2 + $0x170] sm:$0xff]  ;;  %v156_v6 = vld [vmem:[%s544_s2 + $0x168] sm:$0xff] }
   0x2   :  { %v174_v3 = vld [vmem:[%s544_s2 + $0x1f8] sm:$0xff]  ;;  %221 = vmatpush.msra.mxu2 %v158_v1  ;;  %v17_v7 = vshrl.u32 %v16_v0, 7  ;;  %v173_v8 = vld [vmem:[%s544_s2 + $0x1f0] sm:$0xff]  ;;  %v172_v11 = vld [vmem:[%s544_s2 + $0x1e8] sm:$0xff] }
   0x3   :  { %244 = vmatpush.msra.mxu3 %v174_v3  ;;  %v126_v4 = vld [vmem:[%s544_s2 + $0x78] sm:$0xff]  ;;  %v125_v9 = vld [vmem:[%s544_s2 + $0x70] sm:$0xff]  ;;  %v124_v12 = vld [vmem:[%s544_s2 + $0x68] sm:$0xff] }
   0x4   :  { %v142_v5 = vld [vmem:[%s544_s2 + $0xf8] sm:$0xff]  ;;  %175 = vmatpush.msra.mxu0 %v126_v4  ;;  %v141_v10 = vld [vmem:[%s544_s2 + $0xf0] sm:$0xff]  ;;  %222 = vmatpush.msra.mxu2 %v157_v2  ;;  %v19_v13 = vcvt.s32.f32 %v17_v7  ;;  %v18_v14 = vadd.s32 8, %v17_v7  ;;  %v155_v15 = vld [vmem:[%s544_s2 + $0x160] sm:$0xff] }
   0x5   :  { %198 = vmatpush.msra.mxu1 %v142_v5  ;;  %245 = vmatpush.msra.mxu3 %v173_v8  ;;  %v140_v16 = vld [vmem:[%s544_s2 + $0xe8] sm:$0xff]  ;;  %v171_v17 = vld [vmem:[%s544_s2 + $0x1e0] sm:$0xff]  ;;  %v154_v22 = vld [vmem:[%s544_s2 + $0x158] sm:$0xff] }
   0x6   :  { %176 = vmatpush.msra.mxu0 %v125_v9  ;;  %223 = vmatpush.msra.mxu2 %v156_v6  ;;  %v123_v18 = vld [vmem:[%s544_s2 + $0x60] sm:$0xff]  ;;  %v24_v20 = vmul.f32 0.25, %v19_v13  ;;  %v20_v21 = vcvt.s32.f32 %v18_v14  ;;  %v170_v23 = vld [vmem:[%s544_s2 + $0x1d8] sm:$0xff]  ;;  %v153_v28 = vld [vmem:[%s544_s2 + $0x150] sm:$0xff] }
   0x7   :  { %199 = vmatpush.msra.mxu1 %v141_v10  ;;  %246 = vmatpush.msra.mxu3 %v172_v11  ;;  %v139_v19 = vld [vmem:[%s544_s2 + $0xe0] sm:$0xff]  ;;  %v122_v24 = vld [vmem:[%s544_s2 + $0x58] sm:$0xff]  ;;  %v169_v29 = vld [vmem:[%s544_s2 + $0x1d0] sm:$0xff] }
   0x8   :  { %177 = vmatpush.msra.mxu0 %v124_v12  ;;  %224 = vmatpush.msra.mxu2 %v155_v15  ;;  %v138_v25 = vld [vmem:[%s544_s2 + $0xd8] sm:$0xff]  ;;  %v26_v26 = vfloor.f32 %v24_v20  ;;  %v25_v27 = vmul.f32 0.25, %v20_v21  ;;  %v121_v30 = vld [vmem:[%s544_s2 + $0x50] sm:$0xff]  ;;  %v152_v34 = vld [vmem:[%s544_s2 + $0x148] sm:$0xff] }
   0x9   :  { %200 = vmatpush.msra.mxu1 %v140_v16  ;;  %247 = vmatpush.msra.mxu3 %v171_v17  ;;  %v137_v31 = vld [vmem:[%s544_s2 + $0xd0] sm:$0xff]  ;;  %v168_v35 = vld [vmem:[%s544_s2 + $0x1c8] sm:$0xff]  ;;  %v151_v40 = vld [vmem:[%s544_s2 + $0x140] sm:$0xff] }
   0xa   :  { %178 = vmatpush.msra.mxu0 %v123_v18  ;;  %225 = vmatpush.msra.mxu2 %v154_v22  ;;  %v28_v32 = vmul.f32 4.0, %v26_v26  ;;  %v27_v33 = vfloor.f32 %v25_v27  ;;  %v120_v36 = vld [vmem:[%s544_s2 + $0x48] sm:$0xff]  ;;  %v167_v41 = vld [vmem:[%s544_s2 + $0x1c0] sm:$0xff]  ;;  %v150_v45 = vld [vmem:[%s544_s2 + $0x138] sm:$0xff]  ;;  %v274_v47 = vadd.f32 -2.0, %v26_v26 }
   0xb   :  { %201 = vmatpush.msra.mxu1 %v139_v19  ;;  %248 = vmatpush.msra.mxu3 %v170_v23  ;;  %v136_v37 = vld [vmem:[%s544_s2 + $0xc8] sm:$0xff]  ;;  %v119_v42 = vld [vmem:[%s544_s2 + $0x40] sm:$0xff]  ;;  %v166_v46 = vld [vmem:[%s544_s2 + $0x1b8] sm:$0xff] }
   0xc   :  { %179 = vmatpush.msra.mxu0 %v122_v24  ;;  %226 = vmatpush.msra.mxu2 %v153_v28  ;;  %v30_v38 = vsub.f32 %v19_v13, %v28_v32  ;;  %v29_v39 = vmul.f32 4.0, %v27_v33  ;;  %v135_v43 = vld [vmem:[%s544_s2 + $0xc0] sm:$0xff]  ;;  %v118_v48 = vld [vmem:[%s544_s2 + $0x38] sm:$0xff]  ;;  %v149_v51 = vld [vmem:[%s544_s2 + $0x130] sm:$0xff]  ;;  %v275_v56 = vadd.f32 -2.0, %v27_v33  ;;  %v34_v61 = vmul.f32 0.5, %v274_v47 }
   0xd   :  { %202 = vmatpush.msra.mxu1 %v138_v25  ;;  %249 = vmatpush.msra.mxu3 %v169_v29  ;;  %v134_v49 = vld [vmem:[%s544_s2 + $0xb8] sm:$0xff]  ;;  %v165_v52 = vld [vmem:[%s544_s2 + $0x1b0] sm:$0xff]  ;;  %v148_v53 = vld [vmem:[%s544_s2 + $0x128] sm:$0xff] }
   0xe   :  { %180 = vmatpush.msra.mxu0 %v121_v30  ;;  %227 = vmatpush.msra.mxu2 %v152_v34  ;;  %v31_v44 = vsub.f32 %v20_v21, %v29_v39  ;;  %v276_v50 = vadd.f32 -2.0, %v30_v38  ;;  %v117_v54 = vld [vmem:[%s544_s2 + $0x30] sm:$0xff]  ;;  %v147_v58 = vld [vmem:[%s544_s2 + $0x120] sm:$0xff]  ;;  %v164_v59 = vld [vmem:[%s544_s2 + $0x1a8] sm:$0xff]  ;;  %v461_v9 = vmul.f32 0.5, %v275_v56 }
   0xf   :  { %203 = vmatpush.msra.mxu1 %v137_v31  ;;  %250 = vmatpush.msra.mxu3 %v168_v35  ;;  %v133_v55 = vld [vmem:[%s544_s2 + $0xb0] sm:$0xff]  ;;  %v116_v60 = vld [vmem:[%s544_s2 + $0x28] sm:$0xff]  ;;  %v163_v63 = vld [vmem:[%s544_s2 + $0x1a0] sm:$0xff] }
  0x10   :  { %181 = vmatpush.msra.mxu0 %v120_v36  ;;  %228 = vmatpush.msra.mxu2 %v151_v40  ;;  %v277_v57 = vadd.f32 -2.0, %v31_v44  ;;  %v132_v62 = vld [vmem:[%s544_s2 + $0xa8] sm:$0xff]  ;;  %v38_v0 = vmul.f32 0.5, %v276_v50  ;;  %v440_v1 = vld [vmem:[%s545_s0] ss:$2 sm:$0xf] }
  0x11   :  { %204 = vmatpush.msra.mxu1 %v136_v37  ;;  %251 = vmatpush.msra.mxu3 %v167_v41  ;;  %v44_v2 = vperm.slane %v440_v1, 2  ;;  %v446_v3 = vld [vmem:[%s545_s0 + $0x1] ss:$2 sm:$0xf]  ;;  %v45_v8 = vperm.slane %v440_v1, 3  ;;  %v146_v11 = vld [vmem:[%s544_s2 + $0x118] sm:$0xff] }
  0x12   :  { %182 = vmatpush.msra.mxu0 %v119_v42  ;;  %229 = vmatpush.msra.mxu2 %v150_v45  ;;  %v451_v4 = vld [vmem:[%s546_s1] sm:$0xf]  ;;  %v63_v7 = vperm.slane %v446_v3, 2  ;;  %v463_v10 = vmul.f32 0.5, %v277_v57  ;;  %v162_v12 = vld [vmem:[%s544_s2 + $0x198] sm:$0xff]  ;;  %v64_v15 = vperm.slane %v446_v3, 3 }
  0x13   :  { %205 = vmatpush.msra.mxu1 %v135_v43  ;;  %252 = vmatpush.msra.mxu3 %v166_v46  ;;  %v115_v5 = vld [vmem:[%s544_s2 + $0x20] sm:$0xff]  ;;  %v52_v13 = vmul.f32 %v44_v2, %v34_v61  ;;  %v89_v14 = vperm.slane %v451_v4, 2  ;;  %v42_v16 = vperm.slane %v440_v1, 0  ;;  %v114_v17 = vld [vmem:[%s544_s2 + $0x18] sm:$0xff]  ;;  %v53_v20 = vmul.f32 %v45_v8, %v34_v61  ;;  %v145_v23 = vld [vmem:[%s544_s2 + $0x110] sm:$0xff] }
  0x14   :  { %183 = vmatpush.msra.mxu0 %v118_v48  ;;  %230 = vmatpush.msra.mxu2 %v149_v51  ;;  %v131_v6 = vld [vmem:[%s544_s2 + $0xa0] sm:$0xff]  ;;  %v130_v18 = vld [vmem:[%s544_s2 + $0x98] sm:$0xff]  ;;  %v71_v19 = vmul.f32 %v63_v7, %v38_v0  ;;  %v90_v21 = vperm.slane %v451_v4, 3  ;;  %v61_v22 = vperm.slane %v446_v3, 0  ;;  %v161_v24 = vld [vmem:[%s544_s2 + $0x190] sm:$0xff]  ;;  %v72_v25 = vmul.f32 %v64_v15, %v38_v0 }
  0x15   :  { %206 = vmatpush.msra.mxu1 %v134_v49  ;;  %253 = vmatpush.msra.mxu3 %v165_v52  ;;  %v50_v26 = vmul.f32 %v42_v16, %v34_v61  ;;  %v43_v27 = vperm.slane %v440_v1, 1  ;;  %v62_v28 = vperm.slane %v446_v3, 1  ;;  %v113_v29 = vld [vmem:[%s544_s2 + $0x10] sm:$0xff]  ;;  %v87_v33 = vperm.slane %v451_v4, 0  ;;  %v144_v35 = vld [vmem:[%s544_s2 + $0x108] sm:$0xff]  ;;  %v143_v46 = vld [vmem:[%s544_s2 + $0x100] sm:$0xff] }
  0x16   :  { %184 = vmatpush.msra.mxu0 %v117_v54  ;;  %231 = vmatpush.msra.mxu2 %v148_v53  ;;  %v129_v30 = vld [vmem:[%s544_s2 + $0x90] sm:$0xff]  ;;  %v79_v31 = vadd.f32 %v71_v19, %v52_v13  ;;  %v69_v32 = vmul.f32 %v61_v22, %v38_v0  ;;  %v56_v34 = vmul.f32 %v44_v2, %v461_v9  ;;  %v160_v36 = vld [vmem:[%s544_s2 + $0x188] sm:$0xff]  ;;  %v88_v40 = vperm.slane %v451_v4, 1  ;;  %v159_v47 = vld [vmem:[%s544_s2 + $0x180] sm:$0xff] }
  0x17   :  { %207 = vmatpush.msra.mxu1 %v133_v55  ;;  %254 = vmatpush.msra.mxu3 %v164_v59  ;;  %v80_v37 = vadd.f32 %v72_v25, %v53_v20  ;;  %v51_v38 = vmul.f32 %v43_v27, %v34_v61  ;;  %v70_v39 = vmul.f32 %v62_v28, %v38_v0  ;;  %v112_v42 = vld [vmem:[%s544_s2 + $0x8] sm:$0xff]  ;;  %v111_v56 = vld [vmem:[%s544_s2] sm:$0xff] }
  0x18   :  { %185 = vmatpush.msra.mxu0 %v116_v60  ;;  %232 = vmatpush.msra.mxu2 %v147_v58  ;;  %v97_v41 = vadd.f32 %v89_v14, %v79_v31  ;;  %v128_v43 = vld [vmem:[%s544_s2 + $0x88] sm:$0xff]  ;;  %v77_v44 = vadd.f32 %v69_v32, %v50_v26  ;;  %v75_v45 = vmul.f32 %v63_v7, %v463_v10  ;;  %v127_v57 = vld [vmem:[%s544_s2 + $0x80] sm:$0xff] }
  0x19   :  { %208 = vmatpush.msra.mxu1 %v132_v62  ;;  %255 = vmatpush.msra.mxu3 %v163_v63  ;;  %v98_v48 = vadd.f32 %v90_v21, %v80_v37  ;;  %v78_v49 = vadd.f32 %v70_v39, %v51_v38  ;;  %v57_v50 = vmul.f32 %v45_v8, %v461_v9 }
  0x1a   :  { %186 = vmatpush.msra.mxu0 %v115_v5  ;;  %233 = vmatpush.msra.mxu2 %v146_v11  ;;  %v105_v51 = vmax.f32 %v97_v41, 0.0  ;;  %v95_v52 = vadd.f32 %v87_v33, %v77_v44  ;;  %v83_v53 = vadd.f32 %v75_v45, %v56_v34  ;;  %v76_v54 = vmul.f32 %v64_v15, %v463_v10 }
  0x1b   :  { %209 = vmatpush.msra.mxu1 %v131_v6  ;;  %256 = vmatpush.msra.mxu3 %v162_v12  ;;  %v106_v55 = vmax.f32 %v98_v48, 0.0  ;;  %v96_v58 = vadd.f32 %v88_v40, %v78_v49  ;;  %v54_v59 = vmul.f32 %v42_v16, %v461_v9  ;;  %v73_v60 = vmul.f32 %v61_v22, %v463_v10 }
  0x1c   :  { %187 = vmatpush.msra.mxu0 %v114_v17  ;;  %234 = vmatpush.msra.mxu2 %v145_v23  ;;  %v103_v61 = vmax.f32 %v95_v52, 0.0  ;;  %v84_v62 = vadd.f32 %v76_v54, %v57_v50  ;;  %v55_v63 = vmul.f32 %v43_v27, %v461_v9  ;;  %v101_v1 = vadd.f32 %v89_v14, %v83_v53 }
  0x1d   :  { %210 = vmatpush.msra.mxu1 %v130_v18  ;;  %257 = vmatpush.msra.mxu3 %v161_v24  ;;  %v104_v0 = vmax.f32 %v96_v58, 0.0  ;;  %v81_v2 = vadd.f32 %v73_v60, %v54_v59  ;;  %v74_v3 = vmul.f32 %v62_v28, %v463_v10 }
  0x1e   :  { %188 = vmatpush.msra.mxu0 %v113_v29  ;;  %235 = vmatpush.msra.mxu2 %v144_v35  ;;  %v102_v5 = vadd.f32 %v90_v21, %v84_v62  ;;  %v109_v8 = vmax.f32 %v101_v1, 0.0 }
  0x1f   :  { %211 = vmatpush.msra.mxu1 %v129_v30  ;;  %258 = vmatpush.msra.mxu3 %v160_v36  ;;  %v99_v6 = vadd.f32 %v87_v33, %v81_v2  ;;  %v82_v7 = vadd.f32 %v74_v3, %v55_v63 }
  0x20   :  { %189 = vmatpush.msra.mxu0 %v112_v42  ;;  %236 = vmatpush.msra.mxu2 %v143_v46  ;;  %v110_v9 = vmax.f32 %v102_v5, 0.0 }
  0x21   :  { %212 = vmatpush.msra.mxu1 %v128_v43  ;;  %259 = vmatpush.msra.mxu3 %v159_v47  ;;  %v100_v11 = vadd.f32 %v88_v40, %v82_v7  ;;  %v107_v12 = vmax.f32 %v99_v6, 0.0 }
  0x22   :  { %237 = vmatmul.f32.vlgmr.msra.gmra.mxu2 %v105_v51  ;;  %260 = vmatmul.f32.vlgmr.msra.gmra.mxu3 %v106_v55 }
  0x23   :  { %190 = vmatpush.msra.mxu0 %v111_v56  ;;  %213 = vmatpush.msra.mxu1 %v127_v57  ;;  %v108_v13 = vmax.f32 %v100_v11, 0.0 }
  0x24   :  { %191 = vmatmul.f32.vlgmr.msra.gmra.mxu0 %v103_v61  ;;  %214 = vmatmul.f32.vlgmr.msra.gmra.mxu1 %v104_v0 }
  0x2a   :  { %240 = vmatmul.f32.gmra.mxu2 %v109_v8  ;;  %263 = vmatmul.f32.gmra.mxu3 %v110_v9 }
  0x2c   :  { %194 = vmatmul.f32.gmra.mxu0 %v107_v12  ;;  %217 = vmatmul.f32.gmra.mxu1 %v108_v13 }
  0xa1   :  { %v192_v14 = vpop.f32.mrf.mxu0  ;;  %v215_v10 = vpop.f32.mrf.mxu1 }
  0xa2   :  { %v216_v15 = vadd.f32 %v215_v10, %v192_v14 }
  0xa5   :  { %v238_v16 = vpop.f32.mrf.mxu2  ;;  %v261_v17 = vpop.f32.mrf.mxu3 }
  0xa6   :  { %v239_v4 = vadd.f32 %v238_v16, %v216_v15 }
  0xa8   :  { %v262_v18 = vadd.f32 %v261_v17, %v239_v4 }
  0xa9   :  { %v195_v19 = vpop.f32.mrf.mxu0  ;;  %v218_v20 = vpop.f32.mrf.mxu1 }
  0xaa   :  { %268 = vst.msk [vmem:[%s547_s3] sm:$0xff] %vm267_vm0, %v262_v18  ;;  %v219_v21 = vadd.f32 %v218_v20, %v195_v19 }
  0xad   :  { %v241_v22 = vpop.f32.mrf.mxu2  ;;  %v264_v23 = vpop.f32.mrf.mxu3 }
  0xae   :  { %v242_v24 = vadd.f32 %v241_v22, %v219_v21 }
  0xb0   :  { %v265_v25 = vadd.f32 %v264_v23, %v242_v24 }
  0xb2   :  { %269 = vst.msk [vmem:[%s547_s3 + $0x8] sm:$0xff] %vm267_vm0, %v265_v25 }

</bundles_post_ra>
